<compile_context>
chip_gen: v6e
topology: v6e:2x2x1
jax: 0.10.0
libtpu: 0.0.40
codegen_flags: <defaults>
</compile_context>

<pallas_src>
import jax
import jax.numpy as jnp
from jax import lax
from jax.experimental import pallas as pl
from jax.experimental.pallas import tpu as pltpu


def valuenet_kernel(x_ref, w1_ref, b1_ref, w2_ref, b2_ref, o_ref):
    # fc1 on the MXU as W1[H,S] · X[tb,S]ᵀ -> hT[H, tb]; batch lands on the
    # lane axis with no wrapper-side transpose of x (the transposed-RHS
    # contraction is handled inside the kernel / by the MXU feed path).
    h = lax.dot_general(
        w1_ref[...], x_ref[...],
        dimension_numbers=(((1,), (1,)), ((), ())),
        preferred_element_type=jnp.float32,
    )                                                   # [H, tb]
    h = jnp.maximum(h + b1_ref[...], 0.0)               # bias broadcasts over lanes
    # fc2 (hidden -> 1): VPU multiply + XLU sublane reduction instead of an
    # N=1 MXU matmul; result is a lane-dense [1, tb] row.
    v = jnp.sum(h * w2_ref[...], axis=0, keepdims=True)  # [1, tb]
    o_ref[...] = (v + b2_ref[0, 0]).astype(o_ref.dtype)


def _round_up(n, m):
    return ((n + m - 1) // m) * m


def valuenet_forward(x, w1, b1, w2, b2, *, batch_tile=512):
    """x: [B, state_dim]; w1: [H, state_dim] (torch layout); b1: [H, 1];
    w2: [H, 1] (fc2.weight transposed); b2: [1, 1].  Returns [B, 1]."""
    B, S = x.shape
    H = w1.shape[0]
    assert w1.shape == (H, S) and b1.shape == (H, 1)
    assert w2.shape == (H, 1) and b2.shape == (1, 1)

    # Lane-dense tile on the batch axis; pad ragged batches with zero rows.
    tb = min(batch_tile, _round_up(B, 128))
    Bp = _round_up(B, tb)
    grid = Bp // tb

    if Bp != B:
        x = jnp.pad(x, ((0, Bp - B), (0, 0)))           # rows only; x stays [B, S]

    out = pl.pallas_call(
        valuenet_kernel,
        out_shape=jax.ShapeDtypeStruct((1, Bp), jnp.float32),
        grid_spec=pltpu.PrefetchScalarGridSpec(
            num_scalar_prefetch=0,
            grid=(grid,),
            in_specs=[
                pl.BlockSpec((tb, S), lambda i: (i, 0)),            # x tile (natural layout)
                pl.BlockSpec((H, S), lambda i: (0, 0)),             # W1 (VMEM-resident)
                pl.BlockSpec((H, 1), lambda i: (0, 0)),             # b1 column
                pl.BlockSpec((H, 1), lambda i: (0, 0)),             # w2 column
                pl.BlockSpec(memory_space=pltpu.MemorySpace.SMEM),  # b2 scalar
            ],
            out_specs=pl.BlockSpec((1, tb), lambda i: (0, i)),      # lane-dense out
        ),
        compiler_params=pltpu.CompilerParams(
            dimension_semantics=("parallel",)),
    )(x, w1, b1, w2, b2)

    return out[0, :B].reshape(B, 1)


def init_valuenet_params(key, state_dim, hidden_dim):
    """Deterministic init mimicking torch.nn.Linear default U(-1/sqrt(fan_in), 1/sqrt(fan_in))."""
    k1, k2, k3, k4 = jax.random.split(key, 4)
    bound1 = 1.0 / jnp.sqrt(jnp.float32(state_dim))
    bound2 = 1.0 / jnp.sqrt(jnp.float32(hidden_dim))
    # w1 kept in torch layout [out, in]; w2 stored as a column [H, 1].
    w1 = jax.random.uniform(k1, (hidden_dim, state_dim), jnp.float32, -bound1, bound1)
    b1 = jax.random.uniform(k2, (hidden_dim, 1), jnp.float32, -bound1, bound1)
    w2 = jax.random.uniform(k3, (hidden_dim, 1), jnp.float32, -bound2, bound2)
    b2 = jax.random.uniform(k4, (1, 1), jnp.float32, -bound2, bound2)
    return w1, b1, w2, b2


if __name__ == "__main__":
    B, state_dim, hidden_dim = 8, 16, 32

    key = jax.random.PRNGKey(0)
    kx, kp = jax.random.split(key)
    x = jax.random.normal(kx, (B, state_dim), jnp.float32)
    w1, b1, w2, b2 = init_valuenet_params(kp, state_dim, hidden_dim)

    out = valuenet_forward(x, w1, b1, w2, b2)
    out = jax.block_until_ready(out)

    # pure-JAX reference (torch semantics: relu(x @ W1^T + b1) @ W2^T + b2)
    ref = jnp.maximum(x @ w1.T + b1.T, 0.0) @ w2 + b2
    assert out.shape == (B, 1)
    assert jnp.allclose(out, ref, atol=1e-5, rtol=1e-5), "mismatch vs reference"

    print("KERNEL_OK")
</pallas_src>

<mosaic_0001>
module attributes {stable_mosaic.version = 11 : i64} {
  func.func @valuenet_kernel(%arg0: i32, %arg1: memref<128x16xf32, #tpu.memory_space<vmem>>, %arg2: memref<32x16xf32, #tpu.memory_space<vmem>>, %arg3: memref<32x1xf32, #tpu.memory_space<vmem>>, %arg4: memref<32x1xf32, #tpu.memory_space<vmem>>, %arg5: memref<1x1xf32, #tpu.memory_space<smem>>, %arg6: memref<1x128xf32, #tpu.memory_space<vmem>>) attributes {dimension_semantics = [#tpu.dimension_semantics<parallel>], iteration_bounds = array<i64: 1>, scalar_prefetch = 0 : i64, scratch_operands = 0 : i64, tpu.core_type = #tpu.core_type<tc>, window_params = [{transform_indices = @transform_0, window_bounds = array<i64: 128, 16>}, {pipeline_mode = #tpu.pipeline_mode<synchronous>, transform_indices = @transform_1, window_bounds = array<i64: 32, 16>}, {pipeline_mode = #tpu.pipeline_mode<synchronous>, transform_indices = @transform_2, window_bounds = array<i64: 32, 1>}, {pipeline_mode = #tpu.pipeline_mode<synchronous>, transform_indices = @transform_3, window_bounds = array<i64: 32, 1>}, {transform_indices = @transform_4, window_bounds = array<i64: 1, 1>}, {transform_indices = @transform_5, window_bounds = array<i64: 1, 128>}]} {
    %c0 = arith.constant 0 : index
    %c0_0 = arith.constant 0 : index
    %0 = vector.load %arg2[%c0, %c0_0] : memref<32x16xf32, #tpu.memory_space<vmem>>, vector<32x16xf32>
    %c0_1 = arith.constant 0 : index
    %c0_2 = arith.constant 0 : index
    %1 = vector.load %arg1[%c0_1, %c0_2] : memref<128x16xf32, #tpu.memory_space<vmem>>, vector<128x16xf32>
    %cst = arith.constant dense<0.000000e+00> : vector<32x128xf32>
    %2 = tpu.matmul %0, %1, %cst {dimension_numbers = #tpu.dot_dimension_numbers<[1], [1], [0], [0], [0, 0, 1, 0], [], []>} : vector<32x16xf32>, vector<128x16xf32>, vector<32x128xf32> -> vector<32x128xf32>
    %c0_3 = arith.constant 0 : index
    %c0_4 = arith.constant 0 : index
    %3 = vector.load %arg3[%c0_3, %c0_4] : memref<32x1xf32, #tpu.memory_space<vmem>>, vector<32x1xf32>
    %4 = vector.broadcast %3 : vector<32x1xf32> to vector<32x128xf32>
    %5 = arith.addf %2, %4 : vector<32x128xf32>
    %cst_5 = arith.constant 0.000000e+00 : f32
    %6 = vector.broadcast %cst_5 : f32 to vector<32x128xf32>
    %7 = arith.maximumf %5, %6 : vector<32x128xf32>
    %c0_6 = arith.constant 0 : index
    %c0_7 = arith.constant 0 : index
    %8 = vector.load %arg4[%c0_6, %c0_7] : memref<32x1xf32, #tpu.memory_space<vmem>>, vector<32x1xf32>
    %9 = vector.broadcast %8 : vector<32x1xf32> to vector<32x128xf32>
    %10 = arith.mulf %7, %9 : vector<32x128xf32>
    %cst_8 = arith.constant dense<0.000000e+00> : vector<128xf32>
    %11 = vector.multi_reduction <add>, %10, %cst_8 [0] : vector<32x128xf32> to vector<128xf32>
    %12 = vector.shape_cast %11 : vector<128xf32> to vector<1x128xf32>
    %c0_9 = arith.constant 0 : index
    %c0_10 = arith.constant 0 : index
    %13 = memref.load %arg5[%c0_9, %c0_10] : memref<1x1xf32, #tpu.memory_space<smem>>
    %14 = vector.broadcast %13 : f32 to vector<1x128xf32>
    %15 = arith.addf %12, %14 : vector<1x128xf32>
    %c0_11 = arith.constant 0 : index
    %c0_12 = arith.constant 0 : index
    %16 = vector.load %arg6[%c0_11, %c0_12] : memref<1x128xf32, #tpu.memory_space<vmem>>, vector<1x128xf32>
    tpu.vector_store %arg6[%c0_11, %c0_12], %15 {strides = array<i32>} : memref<1x128xf32, #tpu.memory_space<vmem>>, vector<1x128xf32>,
    return
  }
  func.func @transform_0(%arg0: i32) -> (i32, i32) {
    %c0_i32 = arith.constant 0 : i32
    %c0_i32_0 = arith.constant 0 : i32
    return %arg0, %c0_i32 : i32, i32
  }
  func.func @transform_1(%arg0: i32) -> (i32, i32) {
    %c0_i32 = arith.constant 0 : i32
    %c0_i32_0 = arith.constant 0 : i32
    %c0_i32_1 = arith.constant 0 : i32
    return %c0_i32, %c0_i32_0 : i32, i32
  }
  func.func @transform_2(%arg0: i32) -> (i32, i32) {
    %c0_i32 = arith.constant 0 : i32
    %c0_i32_0 = arith.constant 0 : i32
    %c0_i32_1 = arith.constant 0 : i32
    return %c0_i32, %c0_i32_0 : i32, i32
  }
  func.func @transform_3(%arg0: i32) -> (i32, i32) {
    %c0_i32 = arith.constant 0 : i32
    %c0_i32_0 = arith.constant 0 : i32
    %c0_i32_1 = arith.constant 0 : i32
    return %c0_i32, %c0_i32_0 : i32, i32
  }
  func.func @transform_4(%arg0: i32) -> (i32, i32) {
    %c0_i32 = arith.constant 0 : i32
    %c0_i32_0 = arith.constant 0 : i32
    %c0_i32_1 = arith.constant 0 : i32
    return %c0_i32, %c0_i32_0 : i32, i32
  }
  func.func @transform_5(%arg0: i32) -> (i32, i32) {
    %c0_i32 = arith.constant 0 : i32
    %c0_i32_0 = arith.constant 0 : i32
    return %c0_i32, %arg0 : i32, i32
  }
}

</mosaic_0001>

<bundles_post_ra>
// kernel: tpu_custom_call.1
= control target key start
LH: loop header
LB: loop body
LE: loop exit
PB: predicated region body
PF: predicated region fallthrough
CT: control target
= control target key end

     0   :  { %vm66_vm0 = vcmask 130048   ;;  %v407_v3 = vmov 0   ;;  %s597_s0 = inlined_call_operand.vmem [shape: f32[128,16], index: 0, kind: input, shape index: {}]   ;;  %s598_s1 = inlined_call_operand.vmem [shape: f32[32,16], index: 1, kind: input, shape index: {}]   ;;  %s599_s2 = inlined_call_operand.vmem [shape: f32[32,1], index: 2, kind: input, shape index: {}]   ;;  %s600_s3 = inlined_call_operand.vmem [shape: f32[32,1], index: 3, kind: input, shape index: {}]   ;;  %s601_s4 = inlined_call_operand.<no memory space> [shape: f32[1,1], index: 4, kind: input, shape index: {}]   ;;  %s602_s5 = inlined_call_operand.hbm [shape: f32[1,128], index: 5, kind: output, shape index: {}]  }
   0x1   :  { %v41_v0 = vld [vmem:[%s597_s0 + $0x78] sm:$0xff]  ;;  %v40_v1 = vld [vmem:[%s597_s0 + $0x70] sm:$0xff]  ;;  %v39_v2 = vld [vmem:[%s597_s0 + $0x68] sm:$0xff]  ;;  %383 = vset.pattern.permute.xlu0 %v407_v3  ;;  %384 = vset.pattern.permute.xlu1 %v407_v3 }
   0x2   :  { %311 = vmatprep.subr.msk.mxu0 %vm66_vm0, %v41_v0  ;;  %349 = vmatprep.subr.msk.mxu1 %vm66_vm0, %v41_v0  ;;  %v22_v4 = vld [vmem:[%s598_s1] sm:$0xff]  ;;  %v24_v5 = vld [vmem:[%s598_s1 + $0x10] sm:$0xff] }
   0x3   :  { %312 = vmatpush3.xpose.msk.msra.mxu0 %vm66_vm0, %v41_v0  ;;  %365 = vmatpush3.xpose.msk.msra.mxu1 %vm66_vm0, %v41_v0  ;;  %v42_v6 = vld [vmem:[%s599_s2] sm:$0xff]  ;;  %v44_v7 = vld [vmem:[%s599_s2 + $0x10] sm:$0xff] }
   0x4   :  { %313 = vmatprep.subr.msk.mxu0 %vm66_vm0, %v40_v1  ;;  %350 = vmatprep.subr.msk.mxu1 %vm66_vm0, %v40_v1  ;;  %v38_v8 = vld [vmem:[%s597_s0 + $0x60] sm:$0xff] }
   0x5   :  { %343 = vmatprep.mubr.msk.f32.mxu0 %vm66_vm0, %v22_v4  ;;  %346 = vmatprep.mubr.msk.f32.mxu1 %vm66_vm0, %v24_v5 }
   0x6   :  { %48 = vperm.xlu0 %383, %v42_v6   ;;  %58 = vperm.xlu1 %384, %v44_v7  }
   0x7   :  { %314 = vmatpush3.xpose.msk.msra.mxu0 %vm66_vm0, %v40_v1  ;;  %366 = vmatpush3.xpose.msk.msra.mxu1 %vm66_vm0, %v40_v1 }
   0x8   :  { %315 = vmatprep.subr.msk.mxu0 %vm66_vm0, %v39_v2  ;;  %351 = vmatprep.subr.msk.mxu1 %vm66_vm0, %v39_v2 }
   0x9   :  { %11 = vsyncpa [#allocation4], 0  ;;  %v43_v9 = vld [vmem:[%s599_s2 + $0x8] sm:$0xff]  ;;  %v45_v10 = vld [vmem:[%s599_s2 + $0x18] sm:$0xff]  ;;  %v254_v61 = vstv %s601_s4  ;;  %s408_s21 = smov [#allocation3]  }
   0xa   :  { %v37_v11 = vld [vmem:[%s597_s0 + $0x58] sm:$0xff]  ;;  %53 = vperm.xlu0 %383, %v43_v9   ;;  %63 = vperm.xlu1 %384, %v45_v10   ;;  %v216_v12 = vld [vmem:[%s600_s3] sm:$0xff]  ;;  %v217_v13 = vld [vmem:[%s600_s3 + $0x8] sm:$0xff]  ;;  %s263_s22 = sshll.u32 %s408_s21, 4  ;;  %s264_s22 = int_to_ptr.vmem [resolvable:$true] %s263_s22 }
   0xb   :  { %316 = vmatpush3.xpose.msk.msra.mxu0 %vm66_vm0, %v39_v2  ;;  %367 = vmatpush3.xpose.msk.msra.mxu1 %vm66_vm0, %v39_v2  ;;  %v36_v14 = vld [vmem:[%s597_s0 + $0x50] sm:$0xff]  ;;  %v219_v16 = vld [vmem:[%s600_s3 + $0x18] sm:$0xff]  ;;  %v35_v17 = vld [vmem:[%s597_s0 + $0x48] sm:$0xff]  ;;  %s385_s23 = scalar_lea.vmem %s264_s22, 16  ;;  %s389_s24 = scalar_lea.vmem %s264_s22, 32 }
   0xc   :  { %317 = vmatprep.subr.msk.mxu0 %vm66_vm0, %v38_v8  ;;  %352 = vmatprep.subr.msk.mxu1 %vm66_vm0, %v38_v8  ;;  %v218_v15 = vld [vmem:[%s600_s3 + $0x10] sm:$0xff]  ;;  %v34_v18 = vld [vmem:[%s597_s0 + $0x40] sm:$0xff]  ;;  %v33_v19 = vld [vmem:[%s597_s0 + $0x38] sm:$0xff]  ;;  %p386_p0 = scmp.ne.s32.totalorder %s264_s22, %s385_s23  ;;  %p390_p1 = scmp.lt.s32.totalorder %s264_s22, %s264_s22 }
   0xd   :  { %v32_v20 = vld [vmem:[%s597_s0 + $0x30] sm:$0xff]  ;;  %v31_v21 = vld [vmem:[%s597_s0 + $0x28] sm:$0xff]  ;;  %v30_v22 = vld [vmem:[%s597_s0 + $0x20] sm:$0xff]  ;;  %p391_p2 = scmp.lt.s32.totalorder %s389_s24, %s385_s23 }
   0xe   :  { %222 = vperm.xlu0 %383, %v216_v12   ;;  %227 = vperm.xlu1 %384, %v217_v13   ;;  %v29_v23 = vld [vmem:[%s597_s0 + $0x18] sm:$0xff]  ;;  %v28_v24 = vld [vmem:[%s597_s0 + $0x10] sm:$0xff]  ;;  %v27_v25 = vld [vmem:[%s597_s0 + $0x8] sm:$0xff] }
   0xf   :  { %318 = vmatpush3.xpose.msk.msra.mxu0 %vm66_vm0, %v38_v8  ;;  %368 = vmatpush3.xpose.msk.msra.mxu1 %vm66_vm0, %v38_v8  ;;  %v26_v26 = vld [vmem:[%s597_s0] sm:$0xff]  ;;  %v23_v27 = vld [vmem:[%s598_s1 + $0x8] sm:$0xff]  ;;  %v25_v28 = vld [vmem:[%s598_s1 + $0x18] sm:$0xff]  ;;  %p392_p3 = por %p391_p2, %p390_p1 }
  0x10   :  { %319 = vmatprep.subr.msk.mxu0 %vm66_vm0, %v37_v11  ;;  %353 = vmatprep.subr.msk.mxu1 %vm66_vm0, %v37_v11 }
  0x11   :  { %p393_p4 = pnand %p392_p3, %p386_p0 }
  0x12   :  { %232 = vperm.xlu0 %383, %v218_v15   ;;  %237 = vperm.xlu1 %384, %v219_v16  }
  0x13   :  { %320 = vmatpush3.xpose.msk.msra.mxu0 %vm66_vm0, %v37_v11  ;;  %369 = vmatpush3.xpose.msk.msra.mxu1 %vm66_vm0, %v37_v11 }
  0x14   :  { %321 = vmatprep.subr.msk.mxu0 %vm66_vm0, %v36_v14  ;;  %354 = vmatprep.subr.msk.mxu1 %vm66_vm0, %v36_v14 }
  0x17   :  { %322 = vmatpush3.xpose.msk.msra.mxu0 %vm66_vm0, %v36_v14  ;;  %370 = vmatpush3.xpose.msk.msra.mxu1 %vm66_vm0, %v36_v14 }
  0x18   :  { %323 = vmatprep.subr.msk.mxu0 %vm66_vm0, %v35_v17  ;;  %355 = vmatprep.subr.msk.mxu1 %vm66_vm0, %v35_v17 }
  0x1b   :  { %324 = vmatpush3.xpose.msk.msra.mxu0 %vm66_vm0, %v35_v17  ;;  %371 = vmatpush3.xpose.msk.msra.mxu1 %vm66_vm0, %v35_v17 }
  0x1c   :  { %325 = vmatprep.subr.msk.mxu0 %vm66_vm0, %v34_v18  ;;  %356 = vmatprep.subr.msk.mxu1 %vm66_vm0, %v34_v18 }
  0x1f   :  { %326 = vmatpush3.xpose.msk.msra.mxu0 %vm66_vm0, %v34_v18  ;;  %372 = vmatpush3.xpose.msk.msra.mxu1 %vm66_vm0, %v34_v18 }
  0x20   :  { %327 = vmatprep.subr.msk.mxu0 %vm66_vm0, %v33_v19  ;;  %357 = vmatprep.subr.msk.mxu1 %vm66_vm0, %v33_v19 }
  0x23   :  { %328 = vmatpush3.xpose.msk.msra.mxu0 %vm66_vm0, %v33_v19  ;;  %373 = vmatpush3.xpose.msk.msra.mxu1 %vm66_vm0, %v33_v19 }
  0x24   :  { %329 = vmatprep.subr.msk.mxu0 %vm66_vm0, %v32_v20  ;;  %358 = vmatprep.subr.msk.mxu1 %vm66_vm0, %v32_v20 }
  0x27   :  { %330 = vmatpush3.xpose.msk.msra.mxu0 %vm66_vm0, %v32_v20  ;;  %374 = vmatpush3.xpose.msk.msra.mxu1 %vm66_vm0, %v32_v20 }
  0x28   :  { %331 = vmatprep.subr.msk.mxu0 %vm66_vm0, %v31_v21  ;;  %359 = vmatprep.subr.msk.mxu1 %vm66_vm0, %v31_v21 }
  0x2b   :  { %332 = vmatpush3.xpose.msk.msra.mxu0 %vm66_vm0, %v31_v21  ;;  %375 = vmatpush3.xpose.msk.msra.mxu1 %vm66_vm0, %v31_v21 }
  0x2c   :  { %333 = vmatprep.subr.msk.mxu0 %vm66_vm0, %v30_v22  ;;  %360 = vmatprep.subr.msk.mxu1 %vm66_vm0, %v30_v22 }
  0x2f   :  { %334 = vmatpush3.xpose.msk.msra.mxu0 %vm66_vm0, %v30_v22  ;;  %376 = vmatpush3.xpose.msk.msra.mxu1 %vm66_vm0, %v30_v22 }
  0x30   :  { %335 = vmatprep.subr.msk.mxu0 %vm66_vm0, %v29_v23  ;;  %361 = vmatprep.subr.msk.mxu1 %vm66_vm0, %v29_v23 }
  0x33   :  { %336 = vmatpush3.xpose.msk.msra.mxu0 %vm66_vm0, %v29_v23  ;;  %377 = vmatpush3.xpose.msk.msra.mxu1 %vm66_vm0, %v29_v23 }
  0x34   :  { %337 = vmatprep.subr.msk.mxu0 %vm66_vm0, %v28_v24  ;;  %362 = vmatprep.subr.msk.mxu1 %vm66_vm0, %v28_v24 }
  0x37   :  { %338 = vmatpush3.xpose.msk.msra.mxu0 %vm66_vm0, %v28_v24  ;;  %378 = vmatpush3.xpose.msk.msra.mxu1 %vm66_vm0, %v28_v24 }
  0x38   :  { %339 = vmatprep.subr.msk.mxu0 %vm66_vm0, %v27_v25  ;;  %363 = vmatprep.subr.msk.mxu1 %vm66_vm0, %v27_v25 }
  0x3b   :  { %340 = vmatpush3.xpose.msk.msra.mxu0 %vm66_vm0, %v27_v25  ;;  %379 = vmatpush3.xpose.msk.msra.mxu1 %vm66_vm0, %v27_v25 }
  0x3c   :  { %341 = vmatprep.subr.msk.mxu0 %vm66_vm0, %v26_v26  ;;  %364 = vmatprep.subr.msk.mxu1 %vm66_vm0, %v26_v26 }
  0x3f   :  { %342 = vmatpush3.xpose.msk.msra.mxu0 %vm66_vm0, %v26_v26  ;;  %380 = vmatpush3.xpose.msk.msra.mxu1 %vm66_vm0, %v26_v26 }
  0x42   :  { %344 = vmatmul.mubr.msk.f32.vlgmr.msra.gmra.mxu0 %vm66_vm0, %v23_v27  ;;  %347 = vmatmul.mubr.msk.f32.vlgmr.msra.gmra.mxu1 %vm66_vm0, %v25_v28 }
  0x81   :  { %v49_v29 = vpop.permute.xlu0 %48  ;;  %v59_v30 = vpop.permute.xlu1 %58 }
  0x85   :  { %v54_v31 = vpop.permute.xlu0 %53  ;;  %v64_v32 = vpop.permute.xlu1 %63 }
  0x89   :  { %v223_v35 = vpop.permute.xlu0 %222  ;;  %v228_v43 = vpop.permute.xlu1 %227 }
  0x8d   :  { %v233_v49 = vpop.permute.xlu0 %232  ;;  %v238_v52 = vpop.permute.xlu1 %237 }
 0x102   :  { %v345_v33 = vpop.f32.mrf.mxu0  ;;  %v348_v34 = vpop.f32.mrf.mxu1 }
 0x103   :  { %v199_v36 = vadd.f32 %v345_v33, %v54_v31  ;;  %v209_v40 = vadd.f32 %v348_v34, %v64_v32 }
 0x104   :  { %v193_v37 = vpop.f32.mrf.mxu0  ;;  %v203_v38 = vpop.f32.mrf.mxu1 }
 0x105   :  { %v213_v39 = vmax.f32 %v199_v36, 0.0  ;;  %v194_v41 = vadd.f32 %v193_v37, %v49_v29  ;;  %v204_v42 = vadd.f32 %v203_v38, %v59_v30  ;;  %v215_v47 = vmax.f32 %v209_v40, 0.0 }
 0x107   :  { %v212_v44 = vmax.f32 %v194_v41, 0.0  ;;  %v214_v45 = vmax.f32 %v204_v42, 0.0  ;;  %v241_v46 = vmul.f32 %v228_v43, %v213_v39  ;;  %v243_v53 = vmul.f32 %v238_v52, %v215_v47 }
 0x109   :  { %v240_v48 = vmul.f32 %v223_v35, %v212_v44  ;;  %v242_v51 = vmul.f32 %v233_v49, %v214_v45 }
 0x10b   :  { %v244_v50 = vadd.f32 %v241_v46, %v240_v48 }
 0x10d   :  { %v245_v54 = vadd.f32 %v244_v50, %v242_v51 }
 0x10f   :  { %v246_v55 = vadd.f32 %v245_v54, %v243_v53 }
 0x111   :  { %v247_v56 = vrot.slane %v246_v55, 4 }
 0x113   :  { %v248_v57 = vadd.f32 %v247_v56, %v246_v55 }
 0x115   :  { %v249_v58 = vrot.slane %v248_v57, 2 }
 0x117   :  { %v250_v59 = vadd.f32 %v249_v58, %v248_v57 }
 0x119   :  { %v251_v60 = vrot.slane %v250_v59, 1 }
 0x11b   :  { %v252_v62 = vadd.f32 %v251_v60, %v250_v59 }
 0x11d   :  { %v255_v63 = vadd.f32 %v254_v61, %v252_v62 }
 0x11f   :  { %256 = vst [vmem:[#allocation3] sm:$0x1] %v255_v63 }
 0x120   :  { %396 = shalt.err (!%p393_p4)
}
 0x121   :  { %266 = dma.vmem_to_hbm [thread:$0]  %s264_s22, 16, %s602_s5, [#allocation4]  }
 0x122   :  { %405 = dma.done.wait [#allocation4], 16  }
 0x123   :  { %406 = vsyncadd [#allocation4], 4294967280 }
 0x124   :  { %270 = vsyncpa [#allocation4], 1 }

</bundles_post_ra>
